<compile_context>
chip_gen: v6e
topology: v6e:2x2x1
jax: 0.10.0
libtpu: 0.0.40
codegen_flags: <defaults>
</compile_context>

<pallas_src>
import numpy as np
import jax
import jax.numpy as jnp
from jax.experimental import pallas as pl
from jax.experimental.pallas import tpu as pltpu


def _round_up(x, m):
    return (x + m - 1) // m * m


def _sublane_pack(dtype):
    """Rows per packed sublane group: 8 for f32, 16 for bf16, 32 for int8/fp8."""
    return max(8, 32 // int(jnp.dtype(dtype).itemsize))


def _vmem_capacity_bytes():
    try:
        return int(pltpu.get_tpu_info().vmem_capacity_bytes)
    except Exception:  # pragma: no cover - conservative fallback (v7x per-TC size)
        return 64 * 1024 * 1024


def _vmem_limit_bytes(need_bytes, cap_bytes):
    lim = max(int(need_bytes) + (4 << 20), 16 << 20)          # >= default-ish floor
    return int(min(lim, cap_bytes - (2 << 20)))                # never ask for all of VMEM


def _pad_ids(ids, block_n):
    n = ids.shape[0]
    n_pad = _round_up(n, block_n)
    if n_pad != n:
        ids = jnp.pad(ids, (0, n_pad - n))                     # pad with row 0 (valid)
    return ids, n_pad


# ---------------------------------------------------------------------------
# Path 1: tiny vocab -> one-hot matmul on the MXU (exercised by the demo).
# ---------------------------------------------------------------------------
def _gather_onehot(ids, weight, cap):
    num_embeddings, embedding_dim = weight.shape
    itemsize = int(jnp.dtype(weight.dtype).itemsize)
    pack = _sublane_pack(weight.dtype)
    n = ids.shape[0]

    block_n = min(256, _round_up(n, pack))
    ids, n_pad = _pad_ids(ids, block_n)
    ids2d = ids.reshape(n_pad, 1)
    grid = (n_pad // block_n,)

    table_bytes = num_embeddings * embedding_dim * itemsize
    tile_bytes = block_n * embedding_dim * itemsize
    need = 2 * table_bytes + 2 * tile_bytes + 2 * block_n * 4
    cost = pl.CostEstimate(
        flops=2 * n_pad * num_embeddings * embedding_dim,
        transcendentals=0,
        bytes_accessed=int(table_bytes + n_pad * embedding_dim * itemsize + 4 * n_pad),
    )

    def kernel(ids_ref, w_ref, out_ref):
        ids_blk = ids_ref[...]                                  # (block_n, 1) int32
        onehot = (ids_blk == jax.lax.broadcasted_iota(
            jnp.int32, (block_n, num_embeddings), 1)).astype(w_ref.dtype)
        out_ref[...] = jnp.dot(onehot, w_ref[...],
                               preferred_element_type=jnp.float32
                               ).astype(out_ref.dtype)

    return pl.pallas_call(
        kernel,
        out_shape=jax.ShapeDtypeStruct((n_pad, embedding_dim), weight.dtype),
        grid=grid,
        in_specs=[
            pl.BlockSpec((block_n, 1), lambda i: (i, 0)),
            # Constant block index -> fetched once, stays resident across steps.
            pl.BlockSpec((num_embeddings, embedding_dim), lambda i: (0, 0)),
        ],
        out_specs=pl.BlockSpec((block_n, embedding_dim), lambda i: (i, 0)),
        compiler_params=pltpu.CompilerParams(
            dimension_semantics=("parallel",),                  # shard token tiles on v7x
            vmem_limit_bytes=_vmem_limit_bytes(need, cap),
        ),
        cost_estimate=cost,
    )(ids2d, weight)


# ---------------------------------------------------------------------------
# Path 2: medium vocab -> table resident in VMEM, sublane-grouped row gather.
# ---------------------------------------------------------------------------
def _gather_resident(ids, weight, cap):
    num_embeddings, embedding_dim = weight.shape
    itemsize = int(jnp.dtype(weight.dtype).itemsize)
    pack = _sublane_pack(weight.dtype)
    n = ids.shape[0]

    block_n = min(512, _round_up(n, pack))
    ids, n_pad = _pad_ids(ids, block_n)
    grid = (n_pad // block_n,)
    groups = block_n // pack

    table_bytes = num_embeddings * embedding_dim * itemsize
    tile_bytes = block_n * embedding_dim * itemsize
    need = table_bytes + 2 * tile_bytes + 2 * block_n * 4      # weight single-buffered
    cost = pl.CostEstimate(
        flops=0,
        transcendentals=0,
        bytes_accessed=int(table_bytes + n_pad * embedding_dim * itemsize + 4 * n_pad),
    )

    def kernel(ids_ref, w_ref, out_ref):
        # Gather `pack` rows per iteration and emit one dense (pack, D) store,
        # so the single vector-store slot sees unmasked, sublane-dense traffic.
        def body(g, carry):
            base = pl.multiple_of(g * pack, pack)
            rows = [w_ref[pl.ds(ids_ref[g * pack + r], 1), :] for r in range(pack)]
            out_ref[pl.ds(base, pack), :] = jnp.concatenate(rows, axis=0)
            return carry
        jax.lax.fori_loop(0, groups, body, 0, unroll=True)

    return pl.pallas_call(
        kernel,
        out_shape=jax.ShapeDtypeStruct((n_pad, embedding_dim), weight.dtype),
        grid=grid,
        in_specs=[
            # Per-block id tile in SMEM (no whole-array scalar prefetch).
            pl.BlockSpec((block_n,), lambda i: (i,),
                         memory_space=pltpu.MemorySpace.SMEM),
            # Invariant, resident table: single-buffered to halve its VMEM cost.
            pl.BlockSpec((num_embeddings, embedding_dim), lambda i: (0, 0),
                         pipeline_mode=pl.Buffered(1)),
        ],
        out_specs=pl.BlockSpec((block_n, embedding_dim), lambda i: (i, 0)),
        compiler_params=pltpu.CompilerParams(
            dimension_semantics=("parallel",),
            vmem_limit_bytes=_vmem_limit_bytes(need, cap),
        ),
        cost_estimate=cost,
    )(ids, weight)


# ---------------------------------------------------------------------------
# Path 3: large vocab -> weight stays in HBM, batched manual-DMA row gather.
# ---------------------------------------------------------------------------
def _gather_dma(ids, weight, cap):
    num_embeddings, embedding_dim = weight.shape
    itemsize = int(jnp.dtype(weight.dtype).itemsize)
    pack = _sublane_pack(weight.dtype)
    n = ids.shape[0]

    block_n = min(256, _round_up(n, pack))
    ids, n_pad = _pad_ids(ids, block_n)
    grid = (n_pad // block_n,)

    tile_bytes = block_n * embedding_dim * itemsize
    need = 3 * tile_bytes + 2 * block_n * 4                    # slab + double-buffered out
    cost = pl.CostEstimate(
        flops=0,
        transcendentals=0,
        bytes_accessed=int(2 * n_pad * embedding_dim * itemsize + 4 * n_pad),
    )

    def kernel(ids_ref, w_hbm, out_ref, row_buf, sem):
        # Fire block_n row fetches (all in flight on one shared DMA semaphore),
        # drain them, then write one dense (block_n, D) output tile.
        # TODO(synk): 2-deep block double buffering (prefetch next block's rows
        # while this block's output tile is written back).
        def start(j, carry):
            idx = ids_ref[j]
            pltpu.make_async_copy(w_hbm.at[pl.ds(idx, 1), :],
                                  row_buf.at[pl.ds(j, 1), :], sem).start()
            return carry
        jax.lax.fori_loop(0, block_n, start, 0)

        def drain(j, carry):
            idx = ids_ref[j]
            pltpu.make_async_copy(w_hbm.at[pl.ds(idx, 1), :],
                                  row_buf.at[pl.ds(j, 1), :], sem).wait()
            return carry
        jax.lax.fori_loop(0, block_n, drain, 0)

        out_ref[...] = row_buf[...]

    return pl.pallas_call(
        kernel,
        out_shape=jax.ShapeDtypeStruct((n_pad, embedding_dim), weight.dtype),
        grid=grid,
        in_specs=[
            pl.BlockSpec((block_n,), lambda i: (i,),
                         memory_space=pltpu.MemorySpace.SMEM),
            pl.BlockSpec(memory_space=pl.ANY),                  # table stays in HBM
        ],
        out_specs=pl.BlockSpec((block_n, embedding_dim), lambda i: (i, 0)),
        scratch_shapes=[
            pltpu.VMEM((block_n, embedding_dim), weight.dtype),
            pltpu.SemaphoreType.DMA(()),
        ],
        compiler_params=pltpu.CompilerParams(
            dimension_semantics=("arbitrary",),
            vmem_limit_bytes=_vmem_limit_bytes(need, cap),
        ),
        cost_estimate=cost,
    )(ids, weight)


# ---------------------------------------------------------------------------
# Public forward: out = weight[indices]; returns indices.shape + (D,).
# ---------------------------------------------------------------------------
def embedder2_forward(indices, weight):
    orig_shape = tuple(indices.shape)
    num_embeddings, embedding_dim = weight.shape

    ids = jnp.asarray(indices, dtype=jnp.int32).reshape(-1)
    n = ids.shape[0]
    if n == 0:
        return jnp.zeros(orig_shape + (embedding_dim,), dtype=weight.dtype)

    # PyTorch raises on out-of-range indices; clamp so the gather never touches
    # memory outside the table (documented divergence: no error on OOB).
    ids = jnp.clip(ids, 0, num_embeddings - 1)

    itemsize = int(jnp.dtype(weight.dtype).itemsize)
    table_bytes = num_embeddings * embedding_dim * itemsize
    cap = _vmem_capacity_bytes()

    onehot_fits = (num_embeddings <= 512) and (2 * table_bytes <= int(0.55 * cap))
    resident_fits = table_bytes <= int(0.60 * cap)             # single-buffered table

    if onehot_fits:
        out = _gather_onehot(ids, weight, cap)
    elif resident_fits:
        out = _gather_resident(ids, weight, cap)
    else:
        out = _gather_dma(ids, weight, cap)

    return out[:n].reshape(orig_shape + (embedding_dim,))


def make_embedder2_weight(num_embeddings, embedding_dim):
    # Matches Embedder2.__init__: np.random.seed(1); uniform(0, 1, (V, D)) -> float32.
    np.random.seed(1)
    w = np.random.uniform(0, 1, (num_embeddings, embedding_dim)).astype(np.float32)
    return jnp.asarray(w)


if __name__ == "__main__":
    num_embeddings = 16
    embedding_dim = 128  # lane-aligned last dim

    weight = make_embedder2_weight(num_embeddings, embedding_dim)

    # Deterministic integer indices, small shape (batch=2, seq=8).
    key = jax.random.PRNGKey(0)
    indices = jax.random.randint(key, (2, 8), 0, num_embeddings, dtype=jnp.int32)

    out = embedder2_forward(indices, weight)
    out = jax.block_until_ready(out)

    # Reference check (plain JAX gather == F.embedding forward). The one-hot
    # MXU path is bit-exact for f32.
    ref = jnp.take(weight, indices.reshape(-1), axis=0).reshape(2, 8, embedding_dim)
    np.testing.assert_allclose(np.asarray(out), np.asarray(ref), rtol=0, atol=0)

    print("KERNEL_OK")
</pallas_src>

<mosaic_0001>
module attributes {stable_mosaic.version = 11 : i64} {
  func.func @kernel(%arg0: i32, %arg1: memref<16x1xi32, #tpu.memory_space<vmem>>, %arg2: memref<16x128xf32, #tpu.memory_space<vmem>>, %arg3: memref<16x128xf32, #tpu.memory_space<vmem>>) attributes {dimension_semantics = [#tpu.dimension_semantics<parallel>], iteration_bounds = array<i64: 1>, scalar_prefetch = 0 : i64, scratch_operands = 0 : i64, tpu.core_type = #tpu.core_type<tc>, window_params = [{transform_indices = @transform_0, window_bounds = array<i64: 16, 1>}, {pipeline_mode = #tpu.pipeline_mode<synchronous>, transform_indices = @transform_1, window_bounds = array<i64: 16, 128>}, {transform_indices = @transform_2, window_bounds = array<i64: 16, 128>}]} {
    %c0 = arith.constant 0 : index
    %c0_0 = arith.constant 0 : index
    %0 = vector.load %arg1[%c0, %c0_0] : memref<16x1xi32, #tpu.memory_space<vmem>>, vector<16x1xi32>
    %1 = tpu.iota {dimensions = array<i32: 1>} : vector<16x16xi32>
    %2 = vector.broadcast %0 : vector<16x1xi32> to vector<16x16xi32>
    %3 = arith.cmpi eq, %2, %1 : vector<16x16xi32>
    %4 = arith.extui %3 : vector<16x16xi1> to vector<16x16xi32>
    %5 = arith.sitofp %4 : vector<16x16xi32> to vector<16x16xf32>
    %c0_1 = arith.constant 0 : index
    %c0_2 = arith.constant 0 : index
    %6 = vector.load %arg2[%c0_1, %c0_2] : memref<16x128xf32, #tpu.memory_space<vmem>>, vector<16x128xf32>
    %cst = arith.constant dense<0.000000e+00> : vector<16x128xf32>
    %7 = tpu.matmul %5, %6, %cst {dimension_numbers = #tpu.dot_dimension_numbers<[1], [0], [0], [1], [0, 0, 1, 1], [], []>} : vector<16x16xf32>, vector<16x128xf32>, vector<16x128xf32> -> vector<16x128xf32>
    %c0_3 = arith.constant 0 : index
    %c0_4 = arith.constant 0 : index
    %8 = vector.load %arg3[%c0_3, %c0_4] : memref<16x128xf32, #tpu.memory_space<vmem>>, vector<16x128xf32>
    tpu.vector_store %arg3[%c0_3, %c0_4], %7 {strides = array<i32>} : memref<16x128xf32, #tpu.memory_space<vmem>>, vector<16x128xf32>,
    return
  }
  func.func @transform_0(%arg0: i32) -> (i32, i32) {
    %c0_i32 = arith.constant 0 : i32
    %c0_i32_0 = arith.constant 0 : i32
    return %arg0, %c0_i32 : i32, i32
  }
  func.func @transform_1(%arg0: i32) -> (i32, i32) {
    %c0_i32 = arith.constant 0 : i32
    %c0_i32_0 = arith.constant 0 : i32
    %c0_i32_1 = arith.constant 0 : i32
    return %c0_i32, %c0_i32_0 : i32, i32
  }
  func.func @transform_2(%arg0: i32) -> (i32, i32) {
    %c0_i32 = arith.constant 0 : i32
    %c0_i32_0 = arith.constant 0 : i32
    return %arg0, %c0_i32 : i32, i32
  }
}

</mosaic_0001>

<bundles_post_ra>
// kernel: tpu_custom_call.1
= control target key start
LH: loop header
LB: loop body
LE: loop exit
PB: predicated region body
PF: predicated region fallthrough
CT: control target
= control target key end

     0   :  { %v173_v2 = vmov 0   ;;  %s208_s0 = inlined_call_operand.vmem [shape: s32[16,1], index: 0, kind: input, shape index: {}]   ;;  %s209_s1 = inlined_call_operand.vmem [shape: f32[16,128], index: 1, kind: input, shape index: {}]   ;;  %s210_s2 = inlined_call_operand.hbm [shape: f32[16,128], index: 2, kind: output, shape index: {}]  }
   0x1   :  { %v12_v0 = vld [vmem:[%s208_s0] sm:$0xff]  ;;  %v29_v1 = vld [vmem:[%s209_s1 + $0x8] sm:$0xff]  ;;  %150 = vset.pattern.permute.xlu0 %v173_v2 }
   0x2   :  { %138 = vmatprep.subr.mxu0 %v29_v1  ;;  %v28_v3 = vld [vmem:[%s209_s1] sm:$0xff] }
   0x3   :  { %7 = vsyncpa [#allocation3], 0  ;;  %17 = vperm.xlu0 %150, %v12_v0   ;;  %139 = vmatpush3.msra.mxu0 %v29_v1  ;;  %v13_v4 = vld [vmem:[%s208_s0 + $0x8] sm:$0xff]  ;;  %v14_v5 = vlaneseq  ;;  %vm30_vm0 = vcmask 130048   ;;  %v174_v8 = vmov 0.0   ;;  %s175_s1 = smov [#allocation2]  }
   0x4   :  { %140 = vmatprep.subr.mxu0 %v28_v3  ;;  %s119_s17 = sshll.u32 %s175_s1, 4  ;;  %s120_s17 = int_to_ptr.vmem [resolvable:$true] %s119_s17 }
   0x5   :  { %141 = vmatpush3.msra.mxu0 %v28_v3  ;;  %v15_v6 = vand.u32 127, %v14_v5  ;;  %s151_s0 = scalar_lea.vmem %s120_s17, 256  ;;  %p156_p1 = scmp.lt.s32.totalorder %s120_s17, %s120_s17 }
   0x6   :  { %p152_p0 = scmp.ne.s32.totalorder %s120_s17, %s151_s0  ;;  %p157_p2 = scmp.lt.s32.totalorder %s151_s0, %s151_s0 }
   0x7   :  { %20 = vperm.xlu0 %150, %v13_v4  }
   0x8   :  { %p158_p3 = por %p157_p2, %p156_p1 }
   0xa   :  { %p159_p4 = pnand %p158_p3, %p152_p0 }
  0x7e   :  { %v18_v7 = vpop.permute.xlu0 %17 }
  0x7f   :  { %vm22_vm1 = vcmp.eq.s32.totalorder %v18_v7, %v15_v6 }
  0x80   :  { %v130_v9 = vsel %vm22_vm1, 1.0, %v174_v8 }
  0x81   :  { %142 = vmatprep.mubr.msk.f32.mxu0 %vm30_vm0, %v130_v9 }
  0x82   :  { %v21_v10 = vpop.permute.xlu0 %20 }
  0x83   :  { %vm23_vm2 = vcmp.eq.s32.totalorder %v21_v10, %v15_v6 }
  0x84   :  { %v131_v11 = vsel %vm23_vm2, 1.0, %v174_v8 }
  0x85   :  { %143 = vmatmul.mubr.msk.f32.vlgmr.msra.gmra.mxu0 %vm30_vm0, %v131_v11 }
 0x145   :  { %v144_v12 = vpop.f32.mrf.mxu0 }
 0x146   :  { %113 = vst [vmem:[#allocation2 + $0x8] sm:$0xff] %v144_v12 }
 0x147   :  { %v103_v13 = vpop.f32.mrf.mxu0 }
 0x148   :  { %112 = vst [vmem:[#allocation2] sm:$0xff] %v103_v13 }
 0x149   :  { %162 = shalt.err (!%p159_p4)
}
 0x14a   :  { %s176_s18 = smov 128   ;;  %s177_s19 = smov 8  }
 0x14b   :  { %125 = dma.vmem_to_hbm [thread:$0]  %s120_s17, 256, %s210_s2, [#allocation3], %s176_s18, %s176_s18, %s177_s19  }
 0x14c   :  { %171 = dma.done.wait [#allocation3], 256  }
 0x14d   :  { %172 = vsyncadd [#allocation3], 4294967040 }
 0x14e   :  { %129 = vsyncpa [#allocation3], 1 }

</bundles_post_ra>
